<compile_context>
chip_gen: v6e
topology: v6e:2x2x1
jax: 0.10.0
libtpu: 0.0.40
codegen_flags: <defaults>
</compile_context>

<pallas_src>
import functools

import jax
import jax.numpy as jnp
from jax.experimental import pallas as pl
from jax.experimental.pallas import tpu as pltpu


# ----------------------------------------------------------------------------
# Pallas kernel: per batch, PSF of all 3 channels at once.
# ----------------------------------------------------------------------------
def _psf_kernel(x_ref, a1_ref, bc_ref, bs_ref, a2r_ref, a2i_ref, o_ref,
                *, h, eps, inv_hw):
    """psf = Re(IDFT2( FFT2(blur) * conj(FFT2(img)) / (|FFT2(img)|^2 + eps) )).

    x_ref block: (1, 2H, 3W); rows [0:H] = blurred RGB slab, rows [H:2H] = clean
    RGB slab (channels side by side along lanes).  Constants:
      a1  = kron(I2, [Ch; Sh])          (4H, 2H)   row-axis forward DFT, both slabs
      bc  = kron(I3, Cw)                (3W, 3W)   per-channel column cos
      bs  = kron(I3, Sw)                (3W, 3W)   per-channel column sin
      a2r = [Ch; Sh], a2i = [-Sh; Ch]   (2H, H)    row-axis inverse DFT
    """
    x = x_ref[0]                       # (2H, 3W)
    a1 = a1_ref[...]
    bc = bc_ref[...]
    bs = bs_ref[...]
    a2r = a2r_ref[...]
    a2i = a2i_ref[...]

    def dot(a, b):
        return jnp.dot(a, b, preferred_element_type=jnp.float32)

    # ---- forward 2-D DFT of both slabs (blur + img), all channels fused ----
    t = dot(a1, x)                     # (4H, 3W): [Ch xb; Sh xb; Ch xi; Sh xi]
    gc = dot(t, bc)                    # (4H, 3W)
    gs = dot(t, bs)                    # (4H, 3W)

    b_re = gc[0:h] - gs[h:2 * h]                  # blur spectrum (numerator)
    b_im = -(gs[0:h] + gc[h:2 * h])
    a_re = gc[2 * h:3 * h] - gs[3 * h:4 * h]      # img spectrum (denominator)
    a_im = -(gs[2 * h:3 * h] + gc[3 * h:4 * h])

    # ---- regularized spectral division: conj(A) * B / (|A|^2 + eps) ----
    inv = pl.reciprocal(a_re * a_re + a_im * a_im + eps, approx=False)
    k_re = (a_re * b_re + a_im * b_im) * inv      # (H, 3W)
    k_im = (a_re * b_im - a_im * b_re) * inv      # (H, 3W)

    # ---- real part of the inverse 2-D DFT ----
    # [P; Q] = [Ch k_re - Sh k_im ; Sh k_re + Ch k_im]
    pq = dot(a2r, k_re) + dot(a2i, k_im)          # (2H, 3W)
    rc = dot(pq, bc)
    rs = dot(pq, bs)
    psf = (rc[0:h] - rs[h:2 * h]) * inv_hw        # (H, 3W): 3 channel PSFs
    o_ref[0] = psf.astype(o_ref.dtype)


# ----------------------------------------------------------------------------
# Glue
# ----------------------------------------------------------------------------
def _dft_mats(n):
    idx = jnp.arange(n, dtype=jnp.float32)
    ang = 2.0 * jnp.pi * jnp.mod(jnp.outer(idx, idx), n) / n
    return jnp.cos(ang).astype(jnp.float32), jnp.sin(ang).astype(jnp.float32)


def correction_loss_pallas(pred, target, eps=1e-6, loss_weight=1.0, n=40):
    # TODO(synk): weight / avg_factor of @weighted_loss are trivial here
    # (weight=None, reduction='mean' on an already-scalar loss), so omitted.
    B, _, K, _ = pred.shape
    _, c6, H, W = target.shape
    nch = c6 // 2  # 3 color channels

    ch, sh = _dft_mats(H)
    cw, sw = _dft_mats(W)

    m_f = jnp.concatenate([ch, sh], axis=0)                       # (2H, H)
    a1 = jnp.kron(jnp.eye(2, dtype=jnp.float32), m_f)             # (4H, 2H)
    a2r = m_f                                                     # (2H, H)
    a2i = jnp.concatenate([-sh, ch], axis=0)                      # (2H, H)
    eye_c = jnp.eye(nch, dtype=jnp.float32)
    bc = jnp.kron(eye_c, cw)                                      # (3W, 3W)
    bs = jnp.kron(eye_c, sw)                                      # (3W, 3W)

    # Lane-dense slab per batch: (2H, 3W); one input array, one DMA per step.
    blur = target[:, :nch].transpose(0, 2, 1, 3).reshape(B, H, nch * W)
    img = target[:, nch:].transpose(0, 2, 1, 3).reshape(B, H, nch * W)
    slab = jnp.concatenate([blur, img], axis=1).astype(jnp.float32)  # (B, 2H, 3W)

    psf_flat = pl.pallas_call(
        functools.partial(_psf_kernel, h=H, eps=float(eps), inv_hw=1.0 / (H * W)),
        out_shape=jax.ShapeDtypeStruct((B, H, nch * W), jnp.float32),
        grid_spec=pltpu.PrefetchScalarGridSpec(
            num_scalar_prefetch=0,
            grid=(B,),
            in_specs=[
                pl.BlockSpec((1, 2 * H, nch * W), lambda b: (b, 0, 0)),   # slab
                pl.BlockSpec((4 * H, 2 * H), lambda b: (0, 0)),           # a1
                pl.BlockSpec((nch * W, nch * W), lambda b: (0, 0)),       # bc
                pl.BlockSpec((nch * W, nch * W), lambda b: (0, 0)),       # bs
                pl.BlockSpec((2 * H, H), lambda b: (0, 0)),               # a2r
                pl.BlockSpec((2 * H, H), lambda b: (0, 0)),               # a2i
            ],
            out_specs=pl.BlockSpec((1, H, nch * W), lambda b: (b, 0, 0)),
        ),
        compiler_params=pltpu.CompilerParams(
            dimension_semantics=("parallel",)),
    )(slab, a1, bc, bs, a2r, a2i)

    # Back to (B, 3, H, W) for the post-processing glue.
    psf = psf_flat.reshape(B, H, nch, W).transpose(0, 2, 1, 3)

    # convert_otf2psf's quadrant shuffle == roll by K//2 then crop KxK (K odd).
    off = K // 2
    ker = jnp.roll(psf, shift=(off, off), axis=(2, 3))[:, :, :K, :K]  # (B, 3, K, K)

    mask = jnp.prod(ker, axis=1, keepdims=True)
    k_corr = jnp.mean(ker, axis=1, keepdims=True) * (mask > 0).astype(jnp.float32)

    # zeroize_negligible_val + L1 mean stay in plain JAX (fused by XLA).
    # TODO(synk): sort-based thresholding has no clean Pallas equivalent.
    pc = K // 2 + 1
    k_sorted = jnp.sort(k_corr.reshape(B, -1), axis=1)
    k_n_min = 0.75 * k_sorted[:, -(n + 1)]
    filtered = jnp.clip(k_corr - k_n_min[:, None, None, None], 0.0, 1.0)
    filtered = filtered.at[:, :, pc, pc].add(1e-20)
    norm_k = filtered / jnp.sum(filtered, axis=(2, 3), keepdims=True)

    loss = jnp.mean(jnp.abs(pred - norm_k))
    return loss_weight * loss


class CORRLoss:
    """JAX/Pallas counterpart of mmseg CORRLoss (reduction='mean', weight=None path)."""

    def __init__(self, eps=1e-6, reduction="mean", loss_weight=1.0):
        assert reduction == "mean"
        self.eps = float(eps)
        self.loss_weight = float(loss_weight)
        self._fn = jax.jit(functools.partial(
            correction_loss_pallas, eps=self.eps, loss_weight=self.loss_weight))

    def __call__(self, pred, target):
        return self._fn(pred, target)


# ----------------------------------------------------------------------------
# Pure-JAX reference (faithful translation of the torch code, using jnp.fft)
# ----------------------------------------------------------------------------
def correction_loss_reference(pred, target, eps=1e-6, loss_weight=1.0, n=40):
    B, _, K, _ = pred.shape
    H, W = target.shape[2], target.shape[3]
    lr_blured, lr = target[:, :3], target[:, 3:]
    kers = []
    mask = jnp.ones_like(pred)
    centre = K // 2 + 1
    for c in range(3):
        blur = lr_blured[:, c:c + 1].astype(jnp.float32)
        img = lr[:, c:c + 1].astype(jnp.float32)
        fb = jnp.fft.fftn(blur, axes=(1, 2, 3))
        fi = jnp.fft.fftn(img, axes=(1, 2, 3))
        denom = fi.real ** 2 + fi.imag ** 2 + eps
        k = jnp.conj(fi) * fb / denom
        psf = jnp.fft.irfftn(k, s=(1, H, W), axes=(1, 2, 3))
        ker = jnp.zeros((B, 1, K, K), jnp.float32)
        ker = ker.at[:, :, centre - 1:, centre - 1:].set(psf[:, :, :centre, :centre])
        ker = ker.at[:, :, centre - 1:, :centre - 1].set(psf[:, :, :centre, -(centre - 1):])
        ker = ker.at[:, :, :centre - 1, centre - 1:].set(psf[:, :, -(centre - 1):, :centre])
        ker = ker.at[:, :, :centre - 1, :centre - 1].set(psf[:, :, -(centre - 1):, -(centre - 1):])
        kers.append(ker)
        mask = mask * ker
    ks = jnp.concatenate(kers, axis=1)
    k_corr = jnp.mean(ks, axis=1, keepdims=True) * (mask > 0).astype(jnp.float32)
    pc = K // 2 + 1
    k_sorted = jnp.sort(k_corr.reshape(B, -1), axis=1)
    k_n_min = 0.75 * k_sorted[:, -(n + 1)]
    filtered = jnp.clip(k_corr - k_n_min[:, None, None, None], 0.0, 1.0)
    filtered = filtered.at[:, :, pc, pc].add(1e-20)
    norm_k = filtered / jnp.sum(filtered, axis=(2, 3), keepdims=True)
    return loss_weight * jnp.mean(jnp.abs(pred - norm_k))


# ----------------------------------------------------------------------------
if __name__ == "__main__":
    key = jax.random.PRNGKey(0)
    k1, k2, k3 = jax.random.split(key, 3)

    B, H, W, K = 2, 16, 16, 9   # K odd, K*K > 40 (matches the module's math)

    # pred: predicted blur kernel, normalized to sum 1 per image
    pred = jax.random.uniform(k1, (B, 1, K, K), jnp.float32)
    pred = pred / jnp.sum(pred, axis=(2, 3), keepdims=True)

    # target = concat(lr_blured, lr) along channels -> (B, 6, H, W)
    lr = jax.random.normal(k2, (B, 3, H, W), jnp.float32) + 2.0
    noise = 0.05 * jax.random.normal(k3, (B, 3, H, W), jnp.float32)
    lr_blured = 0.8 * lr + 0.2 * jnp.roll(lr, 1, axis=-1) + noise
    target = jnp.concatenate([lr_blured, lr], axis=1)

    loss_fn = CORRLoss(eps=1e-6, reduction="mean", loss_weight=1.0)
    loss = jax.block_until_ready(loss_fn(pred, target))

    ref = jax.block_until_ready(
        correction_loss_reference(pred, target, eps=1e-6, loss_weight=1.0))

    if abs(float(loss) - float(ref)) > 1e-3 + 1e-2 * abs(float(ref)):
        raise AssertionError(f"mismatch: pallas={float(loss)} ref={float(ref)}")

    print("KERNEL_OK")
</pallas_src>

<mosaic_0001>
module attributes {stable_mosaic.version = 11 : i64} {
  func.func @_psf_kernel(%arg0: i32, %arg1: memref<1x32x48xf32, #tpu.memory_space<vmem>>, %arg2: memref<64x32xf32, #tpu.memory_space<vmem>>, %arg3: memref<48x48xf32, #tpu.memory_space<vmem>>, %arg4: memref<48x48xf32, #tpu.memory_space<vmem>>, %arg5: memref<32x16xf32, #tpu.memory_space<vmem>>, %arg6: memref<32x16xf32, #tpu.memory_space<vmem>>, %arg7: memref<1x16x48xf32, #tpu.memory_space<vmem>>) attributes {dimension_semantics = [#tpu.dimension_semantics<parallel>], iteration_bounds = array<i64: 2>, scalar_prefetch = 0 : i64, scratch_operands = 0 : i64, tpu.core_type = #tpu.core_type<tc>, window_params = [{transform_indices = @transform_0, window_bounds = array<i64: 1, 32, 48>}, {pipeline_mode = #tpu.pipeline_mode<synchronous>, transform_indices = @transform_1, window_bounds = array<i64: 64, 32>}, {pipeline_mode = #tpu.pipeline_mode<synchronous>, transform_indices = @transform_2, window_bounds = array<i64: 48, 48>}, {pipeline_mode = #tpu.pipeline_mode<synchronous>, transform_indices = @transform_3, window_bounds = array<i64: 48, 48>}, {pipeline_mode = #tpu.pipeline_mode<synchronous>, transform_indices = @transform_4, window_bounds = array<i64: 32, 16>}, {pipeline_mode = #tpu.pipeline_mode<synchronous>, transform_indices = @transform_5, window_bounds = array<i64: 32, 16>}, {transform_indices = @transform_6, window_bounds = array<i64: 1, 16, 48>}]} {
    %c0 = arith.constant 0 : index
    %c0_0 = arith.constant 0 : index
    %c0_1 = arith.constant 0 : index
    %0 = vector.load %arg1[%c0, %c0_0, %c0_1] : memref<1x32x48xf32, #tpu.memory_space<vmem>>, vector<1x32x48xf32>
    %1 = vector.shape_cast %0 : vector<1x32x48xf32> to vector<32x48xf32>
    %c0_2 = arith.constant 0 : index
    %c0_3 = arith.constant 0 : index
    %2 = vector.load %arg2[%c0_2, %c0_3] : memref<64x32xf32, #tpu.memory_space<vmem>>, vector<64x32xf32>
    %c0_4 = arith.constant 0 : index
    %c0_5 = arith.constant 0 : index
    %3 = vector.load %arg3[%c0_4, %c0_5] : memref<48x48xf32, #tpu.memory_space<vmem>>, vector<48x48xf32>
    %c0_6 = arith.constant 0 : index
    %c0_7 = arith.constant 0 : index
    %4 = vector.load %arg4[%c0_6, %c0_7] : memref<48x48xf32, #tpu.memory_space<vmem>>, vector<48x48xf32>
    %c0_8 = arith.constant 0 : index
    %c0_9 = arith.constant 0 : index
    %5 = vector.load %arg5[%c0_8, %c0_9] : memref<32x16xf32, #tpu.memory_space<vmem>>, vector<32x16xf32>
    %c0_10 = arith.constant 0 : index
    %c0_11 = arith.constant 0 : index
    %6 = vector.load %arg6[%c0_10, %c0_11] : memref<32x16xf32, #tpu.memory_space<vmem>>, vector<32x16xf32>
    %cst = arith.constant dense<0.000000e+00> : vector<64x48xf32>
    %7 = tpu.matmul %2, %1, %cst {dimension_numbers = #tpu.dot_dimension_numbers<[1], [0], [0], [1], [0, 0, 1, 1], [], []>} : vector<64x32xf32>, vector<32x48xf32>, vector<64x48xf32> -> vector<64x48xf32>
    %cst_12 = arith.constant dense<0.000000e+00> : vector<64x48xf32>
    %8 = tpu.matmul %7, %3, %cst_12 {dimension_numbers = #tpu.dot_dimension_numbers<[1], [0], [0], [1], [0, 0, 1, 1], [], []>} : vector<64x48xf32>, vector<48x48xf32>, vector<64x48xf32> -> vector<64x48xf32>
    %cst_13 = arith.constant dense<0.000000e+00> : vector<64x48xf32>
    %9 = tpu.matmul %7, %4, %cst_13 {dimension_numbers = #tpu.dot_dimension_numbers<[1], [0], [0], [1], [0, 0, 1, 1], [], []>} : vector<64x48xf32>, vector<48x48xf32>, vector<64x48xf32> -> vector<64x48xf32>
    %10 = vector.extract_strided_slice %8 {offsets = [0, 0], sizes = [16, 48], strides = [1, 1]} : vector<64x48xf32> to vector<16x48xf32>
    %11 = vector.extract_strided_slice %9 {offsets = [16, 0], sizes = [16, 48], strides = [1, 1]} : vector<64x48xf32> to vector<16x48xf32>
    %12 = arith.subf %10, %11 : vector<16x48xf32>
    %13 = vector.extract_strided_slice %9 {offsets = [0, 0], sizes = [16, 48], strides = [1, 1]} : vector<64x48xf32> to vector<16x48xf32>
    %14 = vector.extract_strided_slice %8 {offsets = [16, 0], sizes = [16, 48], strides = [1, 1]} : vector<64x48xf32> to vector<16x48xf32>
    %15 = arith.addf %13, %14 : vector<16x48xf32>
    %cst_14 = arith.constant 0.000000e+00 : f32
    %16 = vector.broadcast %cst_14 : f32 to vector<16x48xf32>
    %17 = arith.subf %16, %15 : vector<16x48xf32>
    %18 = vector.extract_strided_slice %8 {offsets = [32, 0], sizes = [16, 48], strides = [1, 1]} : vector<64x48xf32> to vector<16x48xf32>
    %19 = vector.extract_strided_slice %9 {offsets = [48, 0], sizes = [16, 48], strides = [1, 1]} : vector<64x48xf32> to vector<16x48xf32>
    %20 = arith.subf %18, %19 : vector<16x48xf32>
    %21 = vector.extract_strided_slice %9 {offsets = [32, 0], sizes = [16, 48], strides = [1, 1]} : vector<64x48xf32> to vector<16x48xf32>
    %22 = vector.extract_strided_slice %8 {offsets = [48, 0], sizes = [16, 48], strides = [1, 1]} : vector<64x48xf32> to vector<16x48xf32>
    %23 = arith.addf %21, %22 : vector<16x48xf32>
    %cst_15 = arith.constant 0.000000e+00 : f32
    %24 = vector.broadcast %cst_15 : f32 to vector<16x48xf32>
    %25 = arith.subf %24, %23 : vector<16x48xf32>
    %26 = arith.mulf %20, %20 : vector<16x48xf32>
    %27 = arith.mulf %25, %25 : vector<16x48xf32>
    %28 = arith.addf %26, %27 : vector<16x48xf32>
    %cst_16 = arith.constant 9.99999997E-7 : f32
    %29 = vector.broadcast %cst_16 : f32 to vector<16x48xf32>
    %30 = arith.addf %28, %29 : vector<16x48xf32>
    %31 = tpu.reciprocal %30 : vector<16x48xf32> -> vector<16x48xf32>
    %32 = arith.mulf %20, %12 : vector<16x48xf32>
    %33 = arith.mulf %25, %17 : vector<16x48xf32>
    %34 = arith.addf %32, %33 : vector<16x48xf32>
    %35 = arith.mulf %34, %31 : vector<16x48xf32>
    %36 = arith.mulf %20, %17 : vector<16x48xf32>
    %37 = arith.mulf %25, %12 : vector<16x48xf32>
    %38 = arith.subf %36, %37 : vector<16x48xf32>
    %39 = arith.mulf %38, %31 : vector<16x48xf32>
    %cst_17 = arith.constant dense<0.000000e+00> : vector<32x48xf32>
    %40 = tpu.matmul %5, %35, %cst_17 {dimension_numbers = #tpu.dot_dimension_numbers<[1], [0], [0], [1], [0, 0, 1, 1], [], []>} : vector<32x16xf32>, vector<16x48xf32>, vector<32x48xf32> -> vector<32x48xf32>
    %cst_18 = arith.constant dense<0.000000e+00> : vector<32x48xf32>
    %41 = tpu.matmul %6, %39, %cst_18 {dimension_numbers = #tpu.dot_dimension_numbers<[1], [0], [0], [1], [0, 0, 1, 1], [], []>} : vector<32x16xf32>, vector<16x48xf32>, vector<32x48xf32> -> vector<32x48xf32>
    %42 = arith.addf %40, %41 : vector<32x48xf32>
    %cst_19 = arith.constant dense<0.000000e+00> : vector<32x48xf32>
    %43 = tpu.matmul %42, %3, %cst_19 {dimension_numbers = #tpu.dot_dimension_numbers<[1], [0], [0], [1], [0, 0, 1, 1], [], []>} : vector<32x48xf32>, vector<48x48xf32>, vector<32x48xf32> -> vector<32x48xf32>
    %cst_20 = arith.constant dense<0.000000e+00> : vector<32x48xf32>
    %44 = tpu.matmul %42, %4, %cst_20 {dimension_numbers = #tpu.dot_dimension_numbers<[1], [0], [0], [1], [0, 0, 1, 1], [], []>} : vector<32x48xf32>, vector<48x48xf32>, vector<32x48xf32> -> vector<32x48xf32>
    %45 = vector.extract_strided_slice %43 {offsets = [0, 0], sizes = [16, 48], strides = [1, 1]} : vector<32x48xf32> to vector<16x48xf32>
    %46 = vector.extract_strided_slice %44 {offsets = [16, 0], sizes = [16, 48], strides = [1, 1]} : vector<32x48xf32> to vector<16x48xf32>
    %47 = arith.subf %45, %46 : vector<16x48xf32>
    %cst_21 = arith.constant 3.906250e-03 : f32
    %48 = vector.broadcast %cst_21 : f32 to vector<16x48xf32>
    %49 = arith.mulf %47, %48 : vector<16x48xf32>
    %c0_22 = arith.constant 0 : index
    %c0_23 = arith.constant 0 : index
    %c0_24 = arith.constant 0 : index
    %50 = vector.load %arg7[%c0_22, %c0_23, %c0_24] : memref<1x16x48xf32, #tpu.memory_space<vmem>>, vector<1x16x48xf32>
    %51 = vector.shape_cast %50 : vector<1x16x48xf32> to vector<16x48xf32>
    %52 = vector.shape_cast %49 : vector<16x48xf32> to vector<1x16x48xf32>
    tpu.vector_store %arg7[%c0_22, %c0_23, %c0_24], %52 {strides = array<i32>} : memref<1x16x48xf32, #tpu.memory_space<vmem>>, vector<1x16x48xf32>,
    return
  }
  func.func @transform_0(%arg0: i32) -> (i32, i32, i32) {
    %c0_i32 = arith.constant 0 : i32
    %c0_i32_0 = arith.constant 0 : i32
    %c0_i32_1 = arith.constant 0 : i32
    return %arg0, %c0_i32, %c0_i32_0 : i32, i32, i32
  }
  func.func @transform_1(%arg0: i32) -> (i32, i32) {
    %c0_i32 = arith.constant 0 : i32
    %c0_i32_0 = arith.constant 0 : i32
    %c0_i32_1 = arith.constant 0 : i32
    return %c0_i32, %c0_i32_0 : i32, i32
  }
  func.func @transform_2(%arg0: i32) -> (i32, i32) {
    %c0_i32 = arith.constant 0 : i32
    %c0_i32_0 = arith.constant 0 : i32
    %c0_i32_1 = arith.constant 0 : i32
    return %c0_i32, %c0_i32_0 : i32, i32
  }
  func.func @transform_3(%arg0: i32) -> (i32, i32) {
    %c0_i32 = arith.constant 0 : i32
    %c0_i32_0 = arith.constant 0 : i32
    %c0_i32_1 = arith.constant 0 : i32
    return %c0_i32, %c0_i32_0 : i32, i32
  }
  func.func @transform_4(%arg0: i32) -> (i32, i32) {
    %c0_i32 = arith.constant 0 : i32
    %c0_i32_0 = arith.constant 0 : i32
    %c0_i32_1 = arith.constant 0 : i32
    return %c0_i32, %c0_i32_0 : i32, i32
  }
  func.func @transform_5(%arg0: i32) -> (i32, i32) {
    %c0_i32 = arith.constant 0 : i32
    %c0_i32_0 = arith.constant 0 : i32
    %c0_i32_1 = arith.constant 0 : i32
    return %c0_i32, %c0_i32_0 : i32, i32
  }
  func.func @transform_6(%arg0: i32) -> (i32, i32, i32) {
    %c0_i32 = arith.constant 0 : i32
    %c0_i32_0 = arith.constant 0 : i32
    %c0_i32_1 = arith.constant 0 : i32
    return %arg0, %c0_i32, %c0_i32_0 : i32, i32, i32
  }
}

</mosaic_0001>

<bundles_post_ra>
// kernel: correction_loss_pallas.1
= control target key start
LH: loop header
LB: loop body
LE: loop exit
PB: predicated region body
PF: predicated region fallthrough
CT: control target
= control target key end

     0   :  { %s1425_s21 = smov 0   ;;  %s1632_s0 = inlined_call_operand.vmem [shape: f32[2,32,48], index: 0, kind: input, shape index: {}]   ;;  %s1633_s1 = inlined_call_operand.vmem [shape: f32[64,32], index: 1, kind: input, shape index: {}]   ;;  %s1634_s2 = inlined_call_operand.vmem [shape: f32[48,48], index: 2, kind: input, shape index: {}]   ;;  %s1635_s3 = inlined_call_operand.vmem [shape: f32[48,48], index: 3, kind: input, shape index: {}]   ;;  %s1636_s4 = inlined_call_operand.vmem [shape: f32[32,16], index: 4, kind: input, shape index: {}]   ;;  %s1637_s5 = inlined_call_operand.vmem [shape: f32[32,16], index: 5, kind: input, shape index: {}]   ;;  %s1638_s6 = inlined_call_operand.vmem [shape: f32[2,16,48], index: 6, kind: output, shape index: {}]  }
   0x1 LB: > { %s1121_s22 = sadd.s32 4294967295, %s1388_s21   ;;  %p1125_p0 = scmp.ge.s32.totalorder %s1388_s21, 1  ;;  %s1388_s21 = sphi %s1425_s21, %s16_s21  }
   0x2   : > { %p212_p1 = scmp.lt.s32.totalorder %s1388_s21, 3 }
   0x4   : > { %p213_p2 = pnand %p1125_p0, %p212_p1 }
   0x5   : > { %p242_p3 = scmp.lt.s32.totalorder (!%p213_p2), %s1121_s22, 1 }
   0x6   : > { %216 = sbr.rel (%p213_p2) target bundleno = 864 (0x360), region = 44 }
   0xb   : > { %v256_v0 = vld [vmem:[%s1633_s1] sm:$0xff]  ;;  %vm284_vm0 = vcmask 261120   ;;  %s1640_s22 = smov (!%p242_p3, %s1121_s22), 1  ;;  %v1442_v1 = vld [vmem:[%s1634_s2 + $0x28] sm:$0xff]  ;;  %v1455_v3 = vld [vmem:[%s1634_s2 + $0x18] sm:$0xff]  ;;  %vm414_vm1 = vcmask 392192  }
   0xc   : > { %1254 = vmatprep.mubr.msk.f32.mxu0 %vm284_vm0, %v256_v0  ;;  %1266 = vmatprep.subr.mxu1 %v1442_v1  ;;  %v1448_v2 = vld [vmem:[%s1634_s2 + $0x20] sm:$0xff]  ;;  %s1172_s29 = sshll.u32 %s1640_s22, 5  ;;  %v1465_v6 = vld [vmem:[%s1634_s2 + $0x10] sm:$0xff]  ;;  %v257_v9 = vld [vmem:[%s1633_s1 + $0x8] sm:$0xff]  ;;  %vm687_vm2 = vcmask 130048   ;;  %s1173_s15 = sshll.u32 %s1640_s22, 4 }
   0xd   : > { %1267 = vmatpush3.msra.mxu1 %v1442_v1  ;;  %s246_s10 = scalar_lea.vmem %s1632_s0, %s1172_s29  ;;  %v1477_v10 = vld [vmem:[%s1635_s3 + $0x28] sm:$0xff]  ;;  %v258_v11 = vld [vmem:[%s1633_s1 + $0x10] sm:$0xff]  ;;  %v1485_v12 = vld [vmem:[%s1635_s3 + $0x20] sm:$0xff]  ;;  %s251_s18 = scalar_lea.vmem %s1638_s6, %s1173_s15 }
   0xe   : > { %1268 = vmatprep.subr.mxu1 %v1448_v2  ;;  %v255_v4 = vld [vmem:[%s246_s10 + $0x18] sm:$0xff]  ;;  %v254_v5 = vld [vmem:[%s246_s10 + $0x10] sm:$0xff]  ;;  %v253_v7 = vld [vmem:[%s246_s10 + $0x8] sm:$0xff] }
   0xf   : > { %1269 = vmatpush3.msra.mxu1 %v1448_v2  ;;  %1246 = vmatprep.subr.mxu0 %v255_v4  ;;  %v252_v8 = vld [vmem:[%s246_s10] sm:$0xff]  ;;  %v259_v13 = vld [vmem:[%s1633_s1 + $0x18] sm:$0xff]  ;;  %v1507_v16 = vld [vmem:[%s1635_s3 + $0x10] sm:$0xff] }
  0x10   : > { %1270 = vmatprep.subr.mxu1 %v1455_v3  ;;  %1247 = vmatpush3.msra.mxu0 %v255_v4  ;;  %v1497_v14 = vld [vmem:[%s1635_s3 + $0x18] sm:$0xff]  ;;  %v260_v15 = vld [vmem:[%s1633_s1 + $0x20] sm:$0xff]  ;;  %v261_v17 = vld [vmem:[%s1633_s1 + $0x28] sm:$0xff] }
  0x11   : > { %1271 = vmatpush3.msra.mxu1 %v1455_v3  ;;  %1248 = vmatprep.subr.mxu0 %v254_v5  ;;  %v262_v18 = vld [vmem:[%s1633_s1 + $0x30] sm:$0xff]  ;;  %v263_v19 = vld [vmem:[%s1633_s1 + $0x38] sm:$0xff]  ;;  %v265_v20 = vld [vmem:[%s1634_s2 + $0x8] sm:$0xff] }
  0x12   : > { %1272 = vmatprep.subr.mxu1 %v1465_v6  ;;  %1249 = vmatpush3.msra.mxu0 %v254_v5  ;;  %v1533_v21 = vld [vmem:[%s1635_s3 + $0x8] sm:$0xff]  ;;  %v264_v22 = vld [vmem:[%s1634_s2] sm:$0xff] }
  0x13   : > { %1273 = vmatpush3.msra.mxu1 %v1465_v6  ;;  %1250 = vmatprep.subr.mxu0 %v253_v7  ;;  %v1543_v23 = vld [vmem:[%s1635_s3] sm:$0xff] }
  0x14   : > { %1251 = vmatpush3.msra.mxu0 %v253_v7  ;;  %1274 = vmatprep.subr.mxu1 %v265_v20  ;;  %v280_v32 = vld [vmem:[%s1637_s5] sm:$0xff] }
  0x15   : > { %1252 = vmatprep.subr.mxu0 %v252_v8  ;;  %1275 = vmatpush3.msra.mxu1 %v265_v20 }
  0x16   : > { %1253 = vmatpush3.msra.mxu0 %v252_v8  ;;  %1276 = vmatprep.subr.mxu1 %v264_v22 }
  0x17   : > { %1255 = vmatmul.mubr.msk.f32.vlgmr.msra.gmra.mxu0 %vm284_vm0, %v257_v9  ;;  %1290 = vmatprep.subr.mxu0 %v1477_v10 }
  0x18   : > { %1257 = vmatprep.mubr.msk.f32.mxu0 %vm284_vm0, %v258_v11  ;;  %1291 = vmatpush3.msra.mxu0 %v1477_v10 }
  0x19   : > { %1292 = vmatprep.subr.mxu0 %v1485_v12  ;;  %1277 = vmatpush3.msra.mxu1 %v264_v22 }
  0x1a   : > { %1293 = vmatpush3.msra.mxu0 %v1485_v12 }
  0x1b   : > { %1258 = vmatmul.mubr.msk.f32.gmra.mxu0 %vm284_vm0, %v259_v13  ;;  %1294 = vmatprep.subr.mxu0 %v1497_v14 }
  0x1c   : > { %1260 = vmatprep.mubr.msk.f32.mxu0 %vm284_vm0, %v260_v15  ;;  %1295 = vmatpush3.msra.mxu0 %v1497_v14 }
  0x1d   : > { %1296 = vmatprep.subr.mxu0 %v1507_v16 }
  0x1e   : > { %1297 = vmatpush3.msra.mxu0 %v1507_v16 }
  0x1f   : > { %1261 = vmatmul.mubr.msk.f32.gmra.mxu0 %vm284_vm0, %v261_v17  ;;  %1298 = vmatprep.subr.mxu0 %v1533_v21 }
  0x20   : > { %1263 = vmatprep.mubr.msk.f32.mxu0 %vm284_vm0, %v262_v18  ;;  %1299 = vmatpush3.msra.mxu0 %v1533_v21 }
  0x21   : > { %1300 = vmatprep.subr.mxu0 %v1543_v23 }
  0x22   : > { %1301 = vmatpush3.msra.mxu0 %v1543_v23 }
  0x23   : > { %1264 = vmatmul.mubr.msk.f32.gmra.mxu0 %vm284_vm0, %v263_v19  ;;  %1334 = vmatprep.subr.mxu0 %v1442_v1 }
  0xd7   : > { %v1256_v24 = vpop.f32.mrf.mxu0 }
  0xd9   : > { %v375_v25 = vpop.f32.mrf.mxu0 }
  0xda   : > { %1278 = vmatprep.mubr.msk.f32.mxu1 %vm414_vm1, %v375_v25  ;;  %1302 = vmatprep.mubr.msk.f32.mxu0 %vm414_vm1, %v375_v25 }
  0xdb   : > { %v1259_v26 = vpop.f32.mrf.mxu0  ;;  %1279 = vmatmul.mubr.msk.f32.vlgmr.msra.gmra.mxu1 %vm414_vm1, %v1256_v24  ;;  %1303 = vmatmul.mubr.msk.f32.vlgmr.msra.gmra.mxu0 %vm414_vm1, %v1256_v24 }
  0xdc   : > { %1335 = vmatpush3.msra.mxu0 %v1442_v1 }
  0xdd   : > { %v385_v27 = vpop.f32.mrf.mxu0  ;;  %1336 = vmatprep.subr.mxu0 %v1448_v2 }
  0xde   : > { %1281 = vmatprep.mubr.msk.f32.mxu1 %vm414_vm1, %v385_v27  ;;  %1305 = vmatprep.mubr.msk.f32.mxu0 %vm414_vm1, %v385_v27 }
  0xdf   : > { %v1262_v28 = vpop.f32.mrf.mxu0  ;;  %1282 = vmatmul.mubr.msk.f32.gmra.mxu1 %vm414_vm1, %v1259_v26  ;;  %1306 = vmatmul.mubr.msk.f32.gmra.mxu0 %vm414_vm1, %v1259_v26  ;;  %v281_v26 = vld [vmem:[%s1637_s5 + $0x8] sm:$0xff] }
  0xe0   : > { %1337 = vmatpush3.msra.mxu0 %v1448_v2 }
  0xe1   : > { %v395_v29 = vpop.f32.mrf.mxu0  ;;  %1338 = vmatprep.subr.mxu0 %v1455_v3 }
  0xe2   : > { %1284 = vmatprep.mubr.msk.f32.mxu1 %vm414_vm1, %v395_v29  ;;  %1308 = vmatprep.mubr.msk.f32.mxu0 %vm414_vm1, %v395_v29  ;;  %v282_v29 = vld [vmem:[%s1637_s5 + $0x10] sm:$0xff] }
  0xe3   : > { %v1265_v30 = vpop.f32.mrf.mxu0  ;;  %1285 = vmatmul.mubr.msk.f32.gmra.mxu1 %vm414_vm1, %v1262_v28  ;;  %1309 = vmatmul.mubr.msk.f32.gmra.mxu0 %vm414_vm1, %v1262_v28 }
  0xe4   : > { %1339 = vmatpush3.msra.mxu0 %v1455_v3 }
  0xe5   : > { %v405_v31 = vpop.f32.mrf.mxu0  ;;  %1340 = vmatprep.subr.mxu0 %v1465_v6 }
  0xe6   : > { %1287 = vmatprep.mubr.msk.f32.mxu1 %vm414_vm1, %v405_v31  ;;  %1311 = vmatprep.mubr.msk.f32.mxu0 %vm414_vm1, %v405_v31  ;;  %v283_v31 = vld [vmem:[%s1637_s5 + $0x18] sm:$0xff] }
  0xe7   : > { %1288 = vmatmul.mubr.msk.f32.gmra.mxu1 %vm414_vm1, %v1265_v30  ;;  %1312 = vmatmul.mubr.msk.f32.gmra.mxu0 %vm414_vm1, %v1265_v30 }
  0xe8   : > { %1341 = vmatpush3.msra.mxu0 %v1465_v6  ;;  %1318 = vmatprep.mubr.msk.f32.mxu1 %vm687_vm2, %v280_v32  ;;  %v276_v32 = vld [vmem:[%s1636_s4] sm:$0xff] }
  0xe9   : > { %1342 = vmatprep.subr.mxu0 %v265_v20 }
  0xea   : > { %1343 = vmatpush3.msra.mxu0 %v265_v20 }
  0xeb   : > { %1344 = vmatprep.subr.mxu0 %v264_v22 }
  0xec   : > { %1345 = vmatpush3.msra.mxu0 %v264_v22 }
 0x19b   : > { %v1280_v33 = vpop.f32.mrf.mxu1  ;;  %v1304_v34 = vpop.f32.mrf.mxu0 }
 0x19d   : > { %v505_v35 = vpop.f32.mrf.mxu1  ;;  %v610_v36 = vpop.f32.mrf.mxu0 }
 0x19f   : > { %v1283_v37 = vpop.f32.mrf.mxu1  ;;  %v1307_v38 = vpop.f32.mrf.mxu0 }
 0x1a0   : > { %v652_v63 = vadd.f32 %v1304_v34, %v1283_v37  ;;  %v650_v0 = vsub.f32 %v1280_v33, %v1307_v38  ;;  %v277_v33 = vld [vmem:[%s1636_s4 + $0x8] sm:$0xff]  ;;  %v278_v34 = vld [vmem:[%s1636_s4 + $0x10] sm:$0xff] }
 0x1a1   : > { %v515_v39 = vpop.f32.mrf.mxu1  ;;  %v620_v40 = vpop.f32.mrf.mxu0 }
 0x1a2   : > { %v651_v1 = vadd.f32 %v610_v36, %v515_v39  ;;  %v654_v2 = vsub.f32 0.0, %v652_v63  ;;  %v649_v4 = vsub.f32 %v505_v35, %v620_v40  ;;  %v279_v35 = vld [vmem:[%s1636_s4 + $0x18] sm:$0xff] }
 0x1a3   : > { %v1286_v41 = vpop.f32.mrf.mxu1  ;;  %v1310_v42 = vpop.f32.mrf.mxu0 }
 0x1a4   : > { %v653_v6 = vsub.f32 0.0, %v651_v1 }
 0x1a5   : > { %v525_v43 = vpop.f32.mrf.mxu1  ;;  %v630_v44 = vpop.f32.mrf.mxu0 }
 0x1a7   : > { %v1289_v45 = vpop.f32.mrf.mxu1  ;;  %v1313_v46 = vpop.f32.mrf.mxu0 }
 0x1a8   : > { %v658_v47 = vadd.f32 %v1310_v42, %v1289_v45  ;;  %v656_v48 = vsub.f32 %v1286_v41, %v1313_v46 }
 0x1a9   : > { %v535_v49 = vpop.f32.mrf.mxu1  ;;  %v640_v50 = vpop.f32.mrf.mxu0 }
 0x1aa   : > { %v660_v51 = vsub.f32 0.0, %v658_v47  ;;  %v657_v52 = vadd.f32 %v630_v44, %v535_v49  ;;  %v655_v53 = vsub.f32 %v525_v43, %v640_v50  ;;  %v662_v55 = vmul.f32 %v656_v48, %v656_v48 }
 0x1ab   : > { %v680_v5 = vmul.f32 %v656_v48, %v654_v2  ;;  %v672_v17 = vmul.f32 %v656_v48, %v650_v0 }
 0x1ac   : > { %v664_v54 = vmul.f32 %v660_v51, %v660_v51  ;;  %v659_v56 = vsub.f32 0.0, %v657_v52  ;;  %v661_v59 = vmul.f32 %v655_v53, %v655_v53  ;;  %v682_v3 = vmul.f32 %v660_v51, %v650_v0 }
 0x1ad   : > { %v674_v11 = vmul.f32 %v660_v51, %v654_v2  ;;  %v679_v13 = vmul.f32 %v655_v53, %v653_v6  ;;  %v671_v22 = vmul.f32 %v655_v53, %v649_v4 }
 0x1ae   : > { %v666_v57 = vadd.f32 %v664_v54, %v662_v55  ;;  %v663_v58 = vmul.f32 %v659_v56, %v659_v56  ;;  %v681_v7 = vmul.f32 %v659_v56, %v649_v4  ;;  %v684_v8 = vsub.f32 %v680_v5, %v682_v3 }
 0x1af   : > { %v673_v18 = vmul.f32 %v659_v56, %v653_v6  ;;  %v676_v25 = vadd.f32 %v674_v11, %v672_v17 }
 0x1b0   : > { %v668_v60 = vadd.f32 1e-06, %v666_v57  ;;  %v665_v61 = vadd.f32 %v663_v58, %v661_v59  ;;  %v683_v19 = vsub.f32 %v679_v13, %v681_v7 }
 0x1b1   : > { %v675_v28 = vadd.f32 %v673_v18, %v671_v22 }
 0x1b2   : > { %1378 = vrcp.f32 %v668_v60  ;;  %v667_v62 = vadd.f32 1e-06, %v665_v61 }
 0x1b4   : > { %1380 = vrcp.f32 %v667_v62 }
 0x1bf   : > { %v1379_v9 = vpop.eup %1378 }
 0x1c0   : > { %v686_v15 = vmul.f32 %v1379_v9, %v684_v8  ;;  %v678_v27 = vmul.f32 %v1379_v9, %v676_v25 }
 0x1c1   : > { %v1381_v20 = vpop.eup %1380 }
 0x1c2   : > { %1314 = vmatprep.subr.mxu1 %v686_v15  ;;  %v685_v24 = vmul.f32 %v1381_v20, %v683_v19  ;;  %v677_v30 = vmul.f32 %v1381_v20, %v675_v28 }
 0x1c3   : > { %1315 = vmatpush3.msra.mxu1 %v686_v15 }
 0x1c4   : > { %1316 = vmatprep.subr.mxu1 %v685_v24 }
 0x1c5   : > { %1317 = vmatpush3.msra.mxu1 %v685_v24 }
 0x1c6   : > { %1319 = vmatmul.mubr.msk.f32.vlgmr.msra.gmra.mxu1 %vm687_vm2, %v281_v26  ;;  %1324 = vmatprep.subr.mxu1 %v678_v27 }
 0x1c7   : > { %1325 = vmatpush3.msra.mxu1 %v678_v27  ;;  %1321 = vmatprep.mubr.msk.f32.mxu1 %vm687_vm2, %v282_v29 }
 0x1c8   : > { %1326 = vmatprep.subr.mxu1 %v677_v30 }
 0x1c9   : > { %1327 = vmatpush3.msra.mxu1 %v677_v30 }
 0x1ca   : > { %1322 = vmatmul.mubr.msk.f32.gmra.mxu1 %vm687_vm2, %v283_v31  ;;  %1352 = vmatprep.subr.mxu1 %v1477_v10 }
 0x1cb   : > { %1328 = vmatprep.mubr.msk.f32.mxu1 %vm687_vm2, %v276_v32 }
 0x1ce   : > { %1329 = vmatmul.mubr.msk.f32.vlgmr.msra.gmra.mxu1 %vm687_vm2, %v277_v33 }
 0x1cf   : > { %1331 = vmatprep.mubr.msk.f32.mxu1 %vm687_vm2, %v278_v34  ;;  %1353 = vmatpush3.msra.mxu1 %v1477_v10 }
 0x1d0   : > { %1354 = vmatprep.subr.mxu1 %v1485_v12 }
 0x1d1   : > { %1355 = vmatpush3.msra.mxu1 %v1485_v12 }
 0x1d2   : > { %1332 = vmatmul.mubr.msk.f32.gmra.mxu1 %vm687_vm2, %v279_v35  ;;  %1356 = vmatprep.subr.mxu1 %v1497_v14 }
 0x1d3   : > { %1357 = vmatpush3.msra.mxu1 %v1497_v14 }
 0x1d4   : > { %1358 = vmatprep.subr.mxu1 %v1507_v16 }
 0x1d5   : > { %1359 = vmatpush3.msra.mxu1 %v1507_v16 }
 0x1d6   : > { %1360 = vmatprep.subr.mxu1 %v1533_v21 }
 0x1d7   : > { %1361 = vmatpush3.msra.mxu1 %v1533_v21 }
 0x1d8   : > { %1362 = vmatprep.subr.mxu1 %v1543_v23 }
 0x1d9   : > { %1363 = vmatpush3.msra.mxu1 %v1543_v23 }
 0x286   : > { %v1320_v10 = vpop.f32.mrf.mxu1 }
 0x288   : > { %v766_v12 = vpop.f32.mrf.mxu1 }
 0x28a   : > { %v1323_v36 = vpop.f32.mrf.mxu1 }
 0x28c   : > { %v776_v37 = vpop.f32.mrf.mxu1 }
 0x28e   : > { %v1330_v38 = vpop.f32.mrf.mxu1 }
 0x28f   : > { %v869_v14 = vadd.f32 %v1330_v38, %v1320_v10 }
 0x290   : > { %v863_v39 = vpop.f32.mrf.mxu1 }
 0x291   : > { %v864_v40 = vadd.f32 %v863_v39, %v766_v12 }
 0x292   : > { %v1333_v41 = vpop.f32.mrf.mxu1 }
 0x293   : > { %1346 = vmatprep.mubr.msk.f32.mxu0 %vm414_vm1, %v864_v40  ;;  %1364 = vmatprep.mubr.msk.f32.mxu1 %vm414_vm1, %v864_v40  ;;  %v879_v23 = vadd.f32 %v1333_v41, %v1323_v36 }
 0x294   : > { %v873_v16 = vpop.f32.mrf.mxu1  ;;  %1347 = vmatmul.mubr.msk.f32.vlgmr.msra.gmra.mxu0 %vm414_vm1, %v869_v14  ;;  %1365 = vmatmul.mubr.msk.f32.vlgmr.msra.gmra.mxu1 %vm414_vm1, %v869_v14 }
 0x295   : > { %v874_v21 = vadd.f32 %v873_v16, %v776_v37 }
 0x297   : > { %1349 = vmatprep.mubr.msk.f32.mxu0 %vm414_vm1, %v874_v21  ;;  %1367 = vmatprep.mubr.msk.f32.mxu1 %vm414_vm1, %v874_v21 }
 0x298   : > { %1350 = vmatmul.mubr.msk.f32.gmra.mxu0 %vm414_vm1, %v879_v23  ;;  %1368 = vmatmul.mubr.msk.f32.gmra.mxu1 %vm414_vm1, %v879_v23 }
 0x354   : > { %v1348_v42 = vpop.f32.mrf.mxu0  ;;  %v1366_v43 = vpop.f32.mrf.mxu1 }
 0x356   : > { %v960_v44 = vpop.f32.mrf.mxu0  ;;  %v1043_v45 = vpop.f32.mrf.mxu1 }
 0x358   : > { %v1351_v46 = vpop.f32.mrf.mxu0  ;;  %v1369_v47 = vpop.f32.mrf.mxu1 }
 0x359   : > { %v1061_v48 = vsub.f32 %v1348_v42, %v1369_v47 }
 0x35a   : > { %v970_v49 = vpop.f32.mrf.mxu0  ;;  %v1051_v50 = vpop.f32.mrf.mxu1 }
 0x35b   : > { %v1063_v51 = vmul.f32 0.00390625, %v1061_v48  ;;  %v1060_v52 = vsub.f32 %v960_v44, %v1051_v50 }
 0x35d   : > { %1065 = vst.msk [vmem:[%s251_s18 + $0x8] sm:$0xff] %vm414_vm1, %v1063_v51  ;;  %v1062_v53 = vmul.f32 0.00390625, %v1060_v52 }
 0x35f   : > { %1064 = vst.msk [vmem:[%s251_s18] sm:$0xff] %vm414_vm1, %v1062_v53 }
 0x360 PF: > { %s16_s21 = sadd.s32 1, %s1388_s21  }
 0x361   : > { %p13_p4 = scmp.ge.s32.totalorder %s16_s21, 4  }
 0x363   :  { %15 = sbr.rel (!%p13_p4) target bundleno = 1 (0x1), region = 74 }

</bundles_post_ra>
